<compile_context>
chip_gen: v5e
topology: v5e:2x2
jax: 0.10.0
libtpu: 0.0.40
codegen_flags: <defaults>
</compile_context>

<pallas_src>
import functools

import jax
import jax.numpy as jnp
from jax import lax
from jax.experimental import pallas as pl
from jax.experimental.pallas import tpu as pltpu


def chebconv_kernel(a_ref, dcol_ref, drow_ref, x_ref, w_ref, b_ref, o_ref,
                    slab_ref, *, k_order, matmul_dtype):
    """One batch element per grid step: build L in VMEM, run the (unrolled)
    Chebyshev recursion, fuse all K+1 projections into a single wide matmul."""
    N = a_ref.shape[1]
    cin = x_ref.shape[2]

    x = x_ref[0]                                    # (N, Cin) f32
    xb = x.astype(matmul_dtype)

    # T_0 = I  ->  T_0 @ X == X  (identity matmul elided).
    slab_ref[:, 0:cin] = xb

    if k_order > 1:
        # Normalized Laplacian in VMEM: L = I - d A d^T (d = rowsum(A)^-1/2 precomputed
        # in the wrapper; the row/col scaling is cheap VPU work hidden under the matmuls).
        a = a_ref[0]                                # (N, N) f32
        dcol = dcol_ref[0]                          # (N, 1) f32
        drow = drow_ref[0]                          # (1, N) f32
        row = lax.broadcasted_iota(jnp.int32, (N, N), 0)
        col = lax.broadcasted_iota(jnp.int32, (N, N), 1)
        eye = (row == col).astype(jnp.float32)
        L = eye - dcol * a * drow                   # f32
        Lb = L.astype(matmul_dtype)

        # T_1 = L.
        slab_ref[:, cin:2 * cin] = jnp.dot(
            Lb, xb, preferred_element_type=jnp.float32).astype(matmul_dtype)

        # T_k = 2 L T_{k-1} - T_{k-2}; fully unrolled, combine kept in f32 on the VPU.
        t_prev, t_cur = eye, L
        for k in range(2, k_order):
            t_new = 2.0 * jnp.dot(Lb, t_cur.astype(matmul_dtype),
                                  preferred_element_type=jnp.float32) - t_prev
            slab_ref[:, k * cin:(k + 1) * cin] = jnp.dot(
                t_new.astype(matmul_dtype), xb,
                preferred_element_type=jnp.float32).astype(matmul_dtype)
            t_prev, t_cur = t_cur, t_new

    # One fused projection: [N, (K+1)*Cin] @ [(K+1)*Cin, Cout_pad]  (+ bias).
    out = jnp.dot(slab_ref[...], w_ref[...].astype(matmul_dtype),
                  preferred_element_type=jnp.float32)
    o_ref[0] = (out + b_ref[...]).astype(o_ref.dtype)


def cheb_conv_forward(x, graph, weight, bias=None, *,
                      matmul_dtype=jnp.bfloat16, lane=128):
    """
    x:      [B, N, C_in]          float32
    graph:  [B, N, N]             float32 adjacency (no self loops)
    weight: [K+1, 1, C_in, C_out] float32
    bias:   [1, 1, C_out]         float32 (or None)
    returns [B, N, C_out]         float32
    """
    B, N, Cin = x.shape
    Kord = weight.shape[0]                # == K + 1
    Cout = weight.shape[-1]
    if bias is None:
        bias = jnp.zeros((1, 1, Cout), dtype=x.dtype)

    # D^{-1/2} from row sums (matches torch get_laplacian(normalize=True)).
    # NOTE: inf for zero-degree nodes, same as the torch reference.
    d = jnp.sum(graph, axis=-1) ** (-0.5)                   # [B, N]
    d_col = d[:, :, None]                                   # [B, N, 1]
    d_row = d[:, None, :]                                   # [B, 1, N]

    # Fuse the K+1 per-order projections into a single matmul operand.
    w_flat = weight.reshape(Kord * Cin, Cout)               # [(K+1)*Cin, Cout]
    b_flat = bias.reshape(1, Cout)

    # Lane-dense output: pad Cout to a multiple of 128 -> unmasked output stores.
    Cout_p = ((Cout + lane - 1) // lane) * lane
    if Cout_p != Cout:
        w_flat = jnp.pad(w_flat, ((0, 0), (0, Cout_p - Cout)))
        b_flat = jnp.pad(b_flat, ((0, 0), (0, Cout_p - Cout)))

    kernel = functools.partial(chebconv_kernel, k_order=Kord,
                               matmul_dtype=matmul_dtype)
    out = pl.pallas_call(
        kernel,
        out_shape=jax.ShapeDtypeStruct((B, N, Cout_p), x.dtype),
        grid_spec=pltpu.PrefetchScalarGridSpec(
            num_scalar_prefetch=0,
            grid=(B,),                                       # batches shard across TCs on v7x
            in_specs=[
                pl.BlockSpec((1, N, N), lambda b: (b, 0, 0)),           # adjacency
                pl.BlockSpec((1, N, 1), lambda b: (b, 0, 0)),           # D^{-1/2} (column)
                pl.BlockSpec((1, 1, N), lambda b: (b, 0, 0)),           # D^{-1/2} (row)
                pl.BlockSpec((1, N, Cin), lambda b: (b, 0, 0)),         # x
                pl.BlockSpec((Kord * Cin, Cout_p), lambda b: (0, 0)),   # fused weight
                pl.BlockSpec((1, Cout_p), lambda b: (0, 0)),            # bias
            ],
            out_specs=pl.BlockSpec((1, N, Cout_p), lambda b: (b, 0, 0)),
            scratch_shapes=[
                pltpu.VMEM((N, Kord * Cin), matmul_dtype),   # fused T_k @ X slab
            ],
        ),
        compiler_params=pltpu.CompilerParams(
            dimension_semantics=("parallel",),
            # Explicit VMEM budget (covers v5e's 16 MiB scoped default); footprint here
            # is tiny, large-N graphs need the column-tiled recursion instead.
            vmem_limit_bytes=32 * 1024 * 1024,
        ),
    )(graph, d_col, d_row, x, w_flat, b_flat)
    return out[..., :Cout]


def ref_forward(x, graph, weight, bias, matmul_dtype=jnp.float32):
    """Pure-JAX reference mirroring the torch module. With matmul_dtype=bf16 it also
    mirrors the kernel's MXU numerics (bf16 operands, f32 accumulation)."""
    B, N, Cin = x.shape
    Kord = weight.shape[0]
    Cout = weight.shape[-1]

    def mm(a, b):
        return jnp.einsum("...ij,...jk->...ik",
                          a.astype(matmul_dtype), b.astype(matmul_dtype),
                          preferred_element_type=jnp.float32)

    d = jnp.sum(graph, axis=-1) ** (-0.5)
    eye = jnp.eye(N, dtype=jnp.float32)
    L = eye[None] - d[:, :, None] * graph * d[:, None, :]

    pieces = [x]                                            # T_0 @ X = X
    if Kord > 1:
        pieces.append(mm(L, x))
        t_prev = jnp.broadcast_to(eye[None], L.shape)
        t_cur = L
        for _ in range(2, Kord):
            t_new = 2.0 * mm(L, t_cur) - t_prev
            pieces.append(mm(t_new, x))
            t_prev, t_cur = t_cur, t_new
    slab = jnp.concatenate(pieces, axis=-1)                 # [B, N, (K+1)*Cin]
    w_flat = weight.reshape(Kord * Cin, Cout)
    out = jnp.einsum("bnc,cd->bnd",
                     slab.astype(matmul_dtype), w_flat.astype(matmul_dtype),
                     preferred_element_type=jnp.float32)
    return out + bias


if __name__ == "__main__":
    B, N, Cin, Cout, K = 2, 16, 8, 32, 3     # K -> K+1 = 4 Chebyshev orders
    key = jax.random.PRNGKey(0)
    kx, kg, kw = jax.random.split(key, 3)

    x = jax.random.normal(kx, (B, N, Cin), dtype=jnp.float32)

    # Adjacency without self loops, strictly positive (so D^{-1/2} is finite).
    adj = jax.random.uniform(kg, (B, N, N), dtype=jnp.float32, minval=0.1, maxval=1.0)
    adj = adj * (1.0 - jnp.eye(N, dtype=jnp.float32))[None, :, :]

    # Xavier-normal weight [K+1, 1, Cin, Cout]; zero bias (matches torch init).
    fan_in = 1 * Cin * Cout
    fan_out = (K + 1) * Cin * Cout
    std = (2.0 / (fan_in + fan_out)) ** 0.5
    weight = std * jax.random.normal(kw, (K + 1, 1, Cin, Cout), dtype=jnp.float32)
    bias = jnp.zeros((1, 1, Cout), dtype=jnp.float32)

    # --- exactness check: f32 MXU path vs the f32 (torch-semantics) reference ---
    out_f32 = jax.block_until_ready(
        cheb_conv_forward(x, adj, weight, bias, matmul_dtype=jnp.float32))
    ref_f32 = ref_forward(x, adj, weight, bias, matmul_dtype=jnp.float32)
    assert out_f32.shape == (B, N, Cout)
    assert jnp.allclose(out_f32, ref_f32, atol=1e-4, rtol=1e-4), \
        f"f32 max abs err {jnp.max(jnp.abs(out_f32 - ref_f32))}"

    # --- fast path (default): bf16 MXU operands, f32 accumulation ---
    out = jax.block_until_ready(cheb_conv_forward(x, adj, weight, bias))
    assert out.shape == (B, N, Cout)
    ref_bf16 = ref_forward(x, adj, weight, bias, matmul_dtype=jnp.bfloat16)
    assert jnp.allclose(out, ref_bf16, atol=5e-3, rtol=5e-3), \
        f"bf16-matched max abs err {jnp.max(jnp.abs(out - ref_bf16))}"
    rel = jnp.linalg.norm(out - ref_f32) / jnp.linalg.norm(ref_f32)
    assert rel < 0.15, f"bf16 vs f32 relative Frobenius err {rel}"

    print("KERNEL_OK")
</pallas_src>

<mosaic_0001>
module attributes {stable_mosaic.version = 11 : i64} {
  func.func @chebconv_kernel(%arg0: i32, %arg1: memref<1x16x16xf32, #tpu.memory_space<vmem>>, %arg2: memref<1x16x1xf32, #tpu.memory_space<vmem>>, %arg3: memref<1x1x16xf32, #tpu.memory_space<vmem>>, %arg4: memref<1x16x8xf32, #tpu.memory_space<vmem>>, %arg5: memref<32x128xf32, #tpu.memory_space<vmem>>, %arg6: memref<1x128xf32, #tpu.memory_space<vmem>>, %arg7: memref<1x16x128xf32, #tpu.memory_space<vmem>>, %arg8: memref<16x32xf32, #tpu.memory_space<vmem>>) attributes {dimension_semantics = [#tpu.dimension_semantics<parallel>], iteration_bounds = array<i64: 2>, scalar_prefetch = 0 : i64, scratch_operands = 1 : i64, tpu.core_type = #tpu.core_type<tc>, window_params = [{transform_indices = @transform_0, window_bounds = array<i64: 1, 16, 16>}, {transform_indices = @transform_1, window_bounds = array<i64: 1, 16, 1>}, {transform_indices = @transform_2, window_bounds = array<i64: 1, 1, 16>}, {transform_indices = @transform_3, window_bounds = array<i64: 1, 16, 8>}, {pipeline_mode = #tpu.pipeline_mode<synchronous>, transform_indices = @transform_4, window_bounds = array<i64: 32, 128>}, {pipeline_mode = #tpu.pipeline_mode<synchronous>, transform_indices = @transform_5, window_bounds = array<i64: 1, 128>}, {transform_indices = @transform_6, window_bounds = array<i64: 1, 16, 128>}]} {
    %c0 = arith.constant 0 : index
    %c0_0 = arith.constant 0 : index
    %c0_1 = arith.constant 0 : index
    %0 = vector.load %arg4[%c0, %c0_0, %c0_1] : memref<1x16x8xf32, #tpu.memory_space<vmem>>, vector<1x16x8xf32>
    %1 = vector.shape_cast %0 : vector<1x16x8xf32> to vector<16x8xf32>
    %c0_2 = arith.constant 0 : index
    %c0_3 = arith.constant 0 : index
    %2 = vector.load %arg8[%c0_2, %c0_3] : memref<16x32xf32, #tpu.memory_space<vmem>>, vector<16x8xf32>
    tpu.vector_store %arg8[%c0_2, %c0_3], %1 {strides = array<i32>} : memref<16x32xf32, #tpu.memory_space<vmem>>, vector<16x8xf32>,
    %c0_4 = arith.constant 0 : index
    %c0_5 = arith.constant 0 : index
    %c0_6 = arith.constant 0 : index
    %3 = vector.load %arg1[%c0_4, %c0_5, %c0_6] : memref<1x16x16xf32, #tpu.memory_space<vmem>>, vector<1x16x16xf32>
    %4 = vector.shape_cast %3 : vector<1x16x16xf32> to vector<16x16xf32>
    %c0_7 = arith.constant 0 : index
    %c0_8 = arith.constant 0 : index
    %c0_9 = arith.constant 0 : index
    %5 = vector.load %arg2[%c0_7, %c0_8, %c0_9] : memref<1x16x1xf32, #tpu.memory_space<vmem>>, vector<1x16x1xf32>
    %6 = vector.shape_cast %5 : vector<1x16x1xf32> to vector<16x1xf32>
    %c0_10 = arith.constant 0 : index
    %c0_11 = arith.constant 0 : index
    %c0_12 = arith.constant 0 : index
    %7 = vector.load %arg3[%c0_10, %c0_11, %c0_12] : memref<1x1x16xf32, #tpu.memory_space<vmem>>, vector<1x1x16xf32>
    %8 = vector.shape_cast %7 : vector<1x1x16xf32> to vector<1x16xf32>
    %9 = tpu.iota {dimensions = array<i32: 0>} : vector<16x16xi32>
    %10 = tpu.iota {dimensions = array<i32: 1>} : vector<16x16xi32>
    %11 = arith.cmpi eq, %9, %10 : vector<16x16xi32>
    %12 = arith.extui %11 : vector<16x16xi1> to vector<16x16xi32>
    %13 = arith.sitofp %12 : vector<16x16xi32> to vector<16x16xf32>
    %14 = vector.broadcast %6 : vector<16x1xf32> to vector<16x16xf32>
    %15 = arith.mulf %14, %4 : vector<16x16xf32>
    %16 = vector.broadcast %8 : vector<1x16xf32> to vector<16x16xf32>
    %17 = arith.mulf %15, %16 : vector<16x16xf32>
    %18 = arith.subf %13, %17 : vector<16x16xf32>
    %cst = arith.constant dense<0.000000e+00> : vector<16x8xf32>
    %19 = tpu.matmul %18, %1, %cst {dimension_numbers = #tpu.dot_dimension_numbers<[1], [0], [0], [1], [0, 0, 1, 1], [], []>} : vector<16x16xf32>, vector<16x8xf32>, vector<16x8xf32> -> vector<16x8xf32>
    %c0_13 = arith.constant 0 : index
    %c8 = arith.constant 8 : index
    %20 = vector.load %arg8[%c0_13, %c8] : memref<16x32xf32, #tpu.memory_space<vmem>>, vector<16x8xf32>
    tpu.vector_store %arg8[%c0_13, %c8], %19 {strides = array<i32>} : memref<16x32xf32, #tpu.memory_space<vmem>>, vector<16x8xf32>,
    %cst_14 = arith.constant dense<0.000000e+00> : vector<16x16xf32>
    %21 = tpu.matmul %18, %18, %cst_14 {dimension_numbers = #tpu.dot_dimension_numbers<[1], [0], [0], [1], [0, 0, 1, 1], [], []>} : vector<16x16xf32>, vector<16x16xf32>, vector<16x16xf32> -> vector<16x16xf32>
    %cst_15 = arith.constant 2.000000e+00 : f32
    %22 = vector.broadcast %cst_15 : f32 to vector<16x16xf32>
    %23 = arith.mulf %22, %21 : vector<16x16xf32>
    %24 = arith.subf %23, %13 : vector<16x16xf32>
    %cst_16 = arith.constant dense<0.000000e+00> : vector<16x8xf32>
    %25 = tpu.matmul %24, %1, %cst_16 {dimension_numbers = #tpu.dot_dimension_numbers<[1], [0], [0], [1], [0, 0, 1, 1], [], []>} : vector<16x16xf32>, vector<16x8xf32>, vector<16x8xf32> -> vector<16x8xf32>
    %c0_17 = arith.constant 0 : index
    %c16 = arith.constant 16 : index
    %26 = vector.load %arg8[%c0_17, %c16] : memref<16x32xf32, #tpu.memory_space<vmem>>, vector<16x8xf32>
    tpu.vector_store %arg8[%c0_17, %c16], %25 {strides = array<i32>} : memref<16x32xf32, #tpu.memory_space<vmem>>, vector<16x8xf32>,
    %cst_18 = arith.constant dense<0.000000e+00> : vector<16x16xf32>
    %27 = tpu.matmul %18, %24, %cst_18 {dimension_numbers = #tpu.dot_dimension_numbers<[1], [0], [0], [1], [0, 0, 1, 1], [], []>} : vector<16x16xf32>, vector<16x16xf32>, vector<16x16xf32> -> vector<16x16xf32>
    %cst_19 = arith.constant 2.000000e+00 : f32
    %28 = vector.broadcast %cst_19 : f32 to vector<16x16xf32>
    %29 = arith.mulf %28, %27 : vector<16x16xf32>
    %30 = arith.subf %29, %18 : vector<16x16xf32>
    %cst_20 = arith.constant dense<0.000000e+00> : vector<16x8xf32>
    %31 = tpu.matmul %30, %1, %cst_20 {dimension_numbers = #tpu.dot_dimension_numbers<[1], [0], [0], [1], [0, 0, 1, 1], [], []>} : vector<16x16xf32>, vector<16x8xf32>, vector<16x8xf32> -> vector<16x8xf32>
    %c0_21 = arith.constant 0 : index
    %c24 = arith.constant 24 : index
    %32 = vector.load %arg8[%c0_21, %c24] : memref<16x32xf32, #tpu.memory_space<vmem>>, vector<16x8xf32>
    tpu.vector_store %arg8[%c0_21, %c24], %31 {strides = array<i32>} : memref<16x32xf32, #tpu.memory_space<vmem>>, vector<16x8xf32>,
    %c0_22 = arith.constant 0 : index
    %c0_23 = arith.constant 0 : index
    %33 = vector.load %arg8[%c0_22, %c0_23] : memref<16x32xf32, #tpu.memory_space<vmem>>, vector<16x32xf32>
    %c0_24 = arith.constant 0 : index
    %c0_25 = arith.constant 0 : index
    %34 = vector.load %arg5[%c0_24, %c0_25] : memref<32x128xf32, #tpu.memory_space<vmem>>, vector<32x128xf32>
    %cst_26 = arith.constant dense<0.000000e+00> : vector<16x128xf32>
    %35 = tpu.matmul %33, %34, %cst_26 {dimension_numbers = #tpu.dot_dimension_numbers<[1], [0], [0], [1], [0, 0, 1, 1], [], []>} : vector<16x32xf32>, vector<32x128xf32>, vector<16x128xf32> -> vector<16x128xf32>
    %c0_27 = arith.constant 0 : index
    %c0_28 = arith.constant 0 : index
    %36 = vector.load %arg6[%c0_27, %c0_28] : memref<1x128xf32, #tpu.memory_space<vmem>>, vector<1x128xf32>
    %37 = vector.broadcast %36 : vector<1x128xf32> to vector<16x128xf32>
    %38 = arith.addf %35, %37 : vector<16x128xf32>
    %c0_29 = arith.constant 0 : index
    %c0_30 = arith.constant 0 : index
    %c0_31 = arith.constant 0 : index
    %39 = vector.load %arg7[%c0_29, %c0_30, %c0_31] : memref<1x16x128xf32, #tpu.memory_space<vmem>>, vector<1x16x128xf32>
    %40 = vector.shape_cast %39 : vector<1x16x128xf32> to vector<16x128xf32>
    %41 = vector.shape_cast %38 : vector<16x128xf32> to vector<1x16x128xf32>
    tpu.vector_store %arg7[%c0_29, %c0_30, %c0_31], %41 {strides = array<i32>} : memref<1x16x128xf32, #tpu.memory_space<vmem>>, vector<1x16x128xf32>,
    return
  }
  func.func @transform_0(%arg0: i32) -> (i32, i32, i32) {
    %c0_i32 = arith.constant 0 : i32
    %c0_i32_0 = arith.constant 0 : i32
    %c0_i32_1 = arith.constant 0 : i32
    return %arg0, %c0_i32, %c0_i32_0 : i32, i32, i32
  }
  func.func @transform_1(%arg0: i32) -> (i32, i32, i32) {
    %c0_i32 = arith.constant 0 : i32
    %c0_i32_0 = arith.constant 0 : i32
    %c0_i32_1 = arith.constant 0 : i32
    return %arg0, %c0_i32, %c0_i32_0 : i32, i32, i32
  }
  func.func @transform_2(%arg0: i32) -> (i32, i32, i32) {
    %c0_i32 = arith.constant 0 : i32
    %c0_i32_0 = arith.constant 0 : i32
    %c0_i32_1 = arith.constant 0 : i32
    return %arg0, %c0_i32, %c0_i32_0 : i32, i32, i32
  }
  func.func @transform_3(%arg0: i32) -> (i32, i32, i32) {
    %c0_i32 = arith.constant 0 : i32
    %c0_i32_0 = arith.constant 0 : i32
    %c0_i32_1 = arith.constant 0 : i32
    return %arg0, %c0_i32, %c0_i32_0 : i32, i32, i32
  }
  func.func @transform_4(%arg0: i32) -> (i32, i32) {
    %c0_i32 = arith.constant 0 : i32
    %c0_i32_0 = arith.constant 0 : i32
    %c0_i32_1 = arith.constant 0 : i32
    return %c0_i32, %c0_i32_0 : i32, i32
  }
  func.func @transform_5(%arg0: i32) -> (i32, i32) {
    %c0_i32 = arith.constant 0 : i32
    %c0_i32_0 = arith.constant 0 : i32
    %c0_i32_1 = arith.constant 0 : i32
    return %c0_i32, %c0_i32_0 : i32, i32
  }
  func.func @transform_6(%arg0: i32) -> (i32, i32, i32) {
    %c0_i32 = arith.constant 0 : i32
    %c0_i32_0 = arith.constant 0 : i32
    %c0_i32_1 = arith.constant 0 : i32
    return %arg0, %c0_i32, %c0_i32_0 : i32, i32, i32
  }
}

</mosaic_0001>

<bundles_post_ra>
// kernel: tpu_custom_call.1
= control target key start
LH: loop header
LB: loop body
LE: loop exit
PB: predicated region body
PF: predicated region fallthrough
CT: control target
= control target key end

     0   :  { %11 = vsyncpa [#allocation4], 0  ;;  %s989_s0 = inlined_call_operand.vmem [shape: f32[2,16,16], index: 0, kind: input, shape index: {}]   ;;  %s990_s1 = inlined_call_operand.vmem [shape: f32[2,16,1], index: 1, kind: input, shape index: {}]   ;;  %s991_s2 = inlined_call_operand.vmem [shape: f32[2,1,16], index: 2, kind: input, shape index: {}]   ;;  %s992_s3 = inlined_call_operand.vmem [shape: f32[2,16,8], index: 3, kind: input, shape index: {}]   ;;  %s993_s4 = inlined_call_operand.vmem [shape: f32[32,128], index: 4, kind: input, shape index: {}]   ;;  %s994_s5 = inlined_call_operand.vmem [shape: f32[1,128], index: 5, kind: input, shape index: {}]   ;;  %s995_s6 = inlined_call_operand.hbm [shape: f32[2,16,128], index: 6, kind: output, shape index: {}]  }
   0x1   :  { %13 = vsyncpa [#allocation4 + $0x1], 0  ;;  %s863_s21 = smov 0   ;;  %s865_s22 = smov 0  }
   0x2   :  { %s867_s23 = smov 0   ;;  %s869_s24 = smov 0  }
   0x3 LB: > { %s884_s25 = sadd.s32 4294967295, %s820_s24   ;;  %s672_s26 = sadd.s32 4294967294, %s820_s24   ;;  %s820_s24 = sphi %s869_s24, %s1001_s24   ;;  %s816_s23 = sphi %s867_s23, %s1000_s23   ;;  %s812_s22 = sphi %s865_s22, %s999_s22   ;;  %s808_s21 = sphi %s863_s21, %s998_s21  }
   0x4   : > { %s888_s27 = sadd.s32 1, %s820_s24   ;;  %s172_s28 = sadd.s32 1, %s816_s23 }
   0x5   : > { %s169_s29 = ssub.s32 %s820_s24, %s888_s27  ;;  %p182_p0 = scmp.ne.s32.totalorder %s816_s23, %s812_s22 }
   0x6   : > { %p170_p1 = scmp.eq.s32.totalorder %s169_s29, 0  ;;  %p183_p2 = scmp.eq.s32.totalorder %s884_s25, 1 }
   0x7   : > { %p188_p3 = scmp.ne.s32.totalorder %s812_s22, %s808_s21  ;;  %p189_p4 = scmp.eq.s32.totalorder %s672_s26, 1 }
   0x8   : > { %s899_s30 = scalar_select %p170_p1, %s816_s23, %s172_s28  }
   0x9   : > { %p901_p5 = por %p183_p2, %p182_p0  ;;  %p905_p6 = por %p189_p4, %p188_p3 }
   0xa   : > { %p675_p7 = scmp.ge.s32.totalorder %s820_s24, 1  ;;  %p243_p8 = scmp.lt.s32.totalorder %s820_s24, 3 }
   0xc   : > { %p244_p9 = pnand %p675_p7, %p243_p8 }
   0xd   : > { %p286_p10 = scmp.lt.s32.totalorder (!%p244_p9), %s884_s25, 1  ;;  %s824_s29 = smov (!%p244_p9), 8  }
   0xe   : > { %247 = sbr.rel (%p244_p9) target bundleno = 819 (0x333), region = 44  ;;  %s778_s26 = scalar_lea.hbm (!%p244_p9), %s995_s6, 32 }
  0x13   : > { %v822_v0 = vmov 0   ;;  %s287_s9 = scalar_select %p286_p10, %s884_s25, 1  ;;  %v314_v5 = vlaneseq  ;;  %v823_v13 = vmov 0.0   ;;  %vm344_vm1 = vcmask 130048   ;;  %v524_v43 = vld [vmem:[%s993_s4 + $0x18] sm:$0xff]  ;;  %v523_v44 = vld [vmem:[%s993_s4 + $0x10] sm:$0xff] }
  0x14   : > { %755 = vset.pattern.permute.xlu0 %v822_v0  ;;  %vm306_vm3 = vcmask 64512   ;;  %vm382_vm4 = vcmask 130112   ;;  %vm449_vm5 = vcmask 195712   ;;  %v522_v45 = vld [vmem:[%s993_s4 + $0x8] sm:$0xff]  ;;  %v521_v46 = vld [vmem:[%s993_s4] sm:$0xff]  ;;  %vm516_vm6 = vcmask 261312  }
  0x15   : > { %s702_s10 = sshll.u32 %s287_s9, 4  ;;  %s298_s13 = scalar_lea.vmem %s991_s2, %s287_s9  ;;  %v315_v6 = vshrl.u32 %v314_v5, 7  ;;  %v318_v8 = vand.u32 127, %v314_v5  ;;  %vm529_vm7 = vcmask 261120   ;;  %v757_v53 = vld [vmem:[%s994_s5] ss:$0 sm:$0xff] }
  0x16   : > { %s295_s16 = scalar_lea.vmem %s990_s1, %s702_s10  ;;  %s303_s19 = scalar_lea.vmem %s992_s3, %s702_s10  ;;  %v756_v10 = vld [vmem:[%s298_s13] ss:$0 sm:$0xff] }
  0x17   : > { %v312_v1 = vld [vmem:[%s295_s16 + $0x8] sm:$0xff]  ;;  %v311_v2 = vld [vmem:[%s295_s16] sm:$0xff]  ;;  %v316_v7 = vadd.s32 8, %v315_v6  ;;  %s290_s28 = scalar_lea.vmem %s989_s0, %s702_s10  ;;  %vm319_vm2 = vcmp.eq.s32.totalorder %v315_v6, %v318_v8  ;;  %s825_s9 = smov 16  }
  0x18   : > { %332 = vperm.xlu0 %755, %v312_v1   ;;  %v305_v3 = vld [vmem:[%s303_s19 + $0x8] sm:$0xff]  ;;  %v304_v4 = vld [vmem:[%s303_s19] sm:$0xff]  ;;  %v683_v20 = vsel %vm319_vm2, 1.0, %v823_v13  ;;  %s826_s10 = smov 24   ;;  %s283_s19 = sand.u32 1, %s812_s22  }
  0x19   : > { %706 = vmatpush.msra.mxu2 %v305_v3  ;;  %365 = vmatpush.msra.mxu0 %v305_v3  ;;  %v310_v9 = vld [vmem:[%s290_s28 + $0x8] sm:$0xff]  ;;  %vm320_vm0 = vcmp.eq.s32.totalorder %v316_v7, %v318_v8  ;;  %v309_v17 = vld [vmem:[%s290_s28] sm:$0xff]  ;;  %307 = vst.msk [vmem:[#allocation2] sm:$0xff] %vm306_vm3, %v304_v4  ;;  %s676_s20 = sshll.u32 %s283_s19, 4  ;;  %s562_s16 = scalar_lea.sflag [#allocation4], %s283_s19 }
  0x1a   : > { %v684_v14 = vsel %vm320_vm0, 1.0, %v823_v13  ;;  %308 = vst.msk [vmem:[#allocation2 + $0x8] sm:$0xff] %vm306_vm3, %v305_v3 }
  0x1b   : > { %707 = vmatpush.msra.mxu2 %v304_v4  ;;  %366 = vmatpush.msra.mxu0 %v304_v4 }
  0x1d   : > { %432 = vmatpush.msrb.mxu2 %v305_v3  ;;  %499 = vmatpush.msrb.mxu0 %v305_v3 }
  0x1f   : > { %433 = vmatpush.msrb.mxu2 %v304_v4  ;;  %500 = vmatpush.msrb.mxu0 %v304_v4 }
  0x20   : > { %327 = vperm.xlu0 %755, %v311_v2  }
  0x8a   : > { %v333_v11 = vpop.permute.xlu0 %332 }
  0x8b   : > { %v336_v12 = vmul.f32 %v333_v11, %v310_v9 }
  0x8d   : > { %v341_v15 = vmul.f32 %v756_v10, %v336_v12 }
  0x8f   : > { %v343_v16 = vsub.f32 %v684_v14, %v341_v15 }
  0x91   : > { %686 = vmatmul.msk.f32.vlgmr.msra.gmra.mxu2 %vm344_vm1, %v343_v16  ;;  %399 = vmatpush.msra.mxu1 %v343_v16 }
  0x92   : > { %708 = vmatpush.msra.mxu3 %v343_v16  ;;  %v328_v18 = vpop.permute.xlu0 %327 }
  0x93   : > { %v335_v19 = vmul.f32 %v328_v18, %v309_v17 }
  0x95   : > { %v340_v21 = vmul.f32 %v756_v10, %v335_v19 }
  0x97   : > { %v342_v22 = vsub.f32 %v683_v20, %v340_v21 }
  0x99   : > { %685 = vmatmul.msk.f32.vlgmr.msra.gmra.mxu0 %vm344_vm1, %v342_v22  ;;  %400 = vmatpush.msra.mxu1 %v342_v22 }
  0x9a   : > { %709 = vmatpush.msra.mxu3 %v342_v22  ;;  %687 = vmatmul.msk.f32.vlgmr.msra.gmra.mxu1 %vm344_vm1, %v342_v22 }
  0x9b   : > { %688 = vmatmul.msk.f32.vlgmr.msra.gmra.mxu3 %vm344_vm1, %v343_v16  ;;  %548 = vmatpush.msrb.mxu1 %v524_v43 }
  0x9d   : > { %549 = vmatpush.msrb.mxu1 %v523_v44 }
  0x9f   : > { %550 = vmatpush.msrb.mxu1 %v522_v45 }
  0xa1   : > { %551 = vmatpush.msrb.mxu1 %v521_v46 }
 0x114   : > { %v371_v31 = vpop.f32.mrf.mxu2 }
 0x116   : > { %v368_v23 = vpop.f32.mrf.mxu0 }
 0x117   : > { %v402_v24 = vpop.f32.mrf.mxu1  ;;  %376 = vrot.lane.b32.xlu1 %v368_v23, %s824_s29 }
 0x118   : > { %v408_v25 = vmul.f32 2.0, %v402_v24 }
 0x11a   : > { %v410_v26 = vsub.f32 %v408_v25, %v683_v20 }
 0x11c   : > { %689 = vmatmul.msk.f32.vlgmr.msrb.gmra.mxu2 %vm344_vm1, %v410_v26 }
 0x11e   : > { %v405_v27 = vpop.f32.mrf.mxu3 }
 0x11f   : > { %v409_v28 = vmul.f32 2.0, %v405_v27 }
 0x121   : > { %v411_v29 = vsub.f32 %v409_v28, %v684_v14 }
 0x123   : > { %466 = vmatpush.msrb.mxu3 %v411_v29 }
 0x124   : > { %690 = vmatmul.msk.f32.gmra.mxu2 %vm344_vm1, %v411_v29 }
 0x125   : > { %467 = vmatpush.msrb.mxu3 %v410_v26 }
 0x126   : > { %691 = vmatmul.msk.f32.vlgmr.msrb.gmra.mxu3 %vm344_vm1, %v342_v22 }
 0x12e   : > { %692 = vmatmul.msk.f32.gmra.mxu3 %vm344_vm1, %v343_v16 }
 0x189   : > { %v377_v30 = vpop.permute.xlu1 %376 }
 0x18a   : > { %383 = vst.msk [vmem:[#allocation2] sm:$0xff] %vm382_vm4, %v377_v30 }
 0x19f   : > { %v435_v32 = vpop.f32.mrf.mxu2 }
 0x1a0   : > { %443 = vrot.lane.b32.xlu1 %v435_v32, %s825_s9 }
 0x1a7   : > { %v438_v33 = vpop.f32.mrf.mxu2 }
 0x1a8   : > { %445 = vrot.lane.b32.xlu0 %v438_v33, %s825_s9  ;;  %s285_s9 = scalar_lea.vmem [#allocation3], %s676_s20 }
 0x1a9   : > { %v469_v34 = vpop.f32.mrf.mxu3  ;;  %s574_s14 = sshll.u32 %s285_s9, 4  ;;  %s575_s14 = int_to_ptr.vmem [resolvable:$true] %s574_s14 }
 0x1aa   : > { %v475_v35 = vmul.f32 2.0, %v469_v34 }
 0x1ac   : > { %v477_v36 = vsub.f32 %v475_v35, %v342_v22 }
 0x1ae   : > { %693 = vmatmul.msk.f32.vlgmr.msrb.gmra.mxu0 %vm344_vm1, %v477_v36 }
 0x1b1   : > { %v472_v37 = vpop.f32.mrf.mxu3 }
 0x1b2   : > { %v476_v38 = vmul.f32 2.0, %v472_v37 }
 0x1b4   : > { %v478_v39 = vsub.f32 %v476_v38, %v343_v16 }
 0x1b6   : > { %694 = vmatmul.msk.f32.gmra.mxu0 %vm344_vm1, %v478_v39 }
 0x212   : > { %v444_v40 = vpop.permute.xlu1 %443 }
 0x213   : > { %450 = vst.msk [vmem:[#allocation2] sm:$0xff] %vm449_vm5, %v444_v40 }
 0x21a   : > { %v446_v50 = vpop.permute.xlu0 %445 }
 0x22b   : > { %v502_v41 = vpop.f32.mrf.mxu0 }
 0x22c   : > { %510 = vrot.lane.b32.xlu2 %v502_v41, %s826_s10 }
 0x233   : > { %v505_v42 = vpop.f32.mrf.mxu0 }
 0x234   : > { %378 = vrot.lane.b32.xlu2 %v371_v31, %s824_s29  ;;  %512 = vrot.lane.b32.xlu1 %v505_v42, %s826_s10  ;;  %s705_s10 = sshll.u32 %s884_s25, 4 }
 0x235   : > { %s573_s13 = scalar_lea.hbm %s995_s6, %s705_s10 }
 0x236   : > { %s576_s15 = sshll.u32 %s573_s13, 4  ;;  %s577_s15 = int_to_ptr.hbm [resolvable:$true] %s576_s15 }
 0x237   : > { %s772_s17 = sshra.s32 %s577_s15, 4  ;;  %s773_s17 = int_to_ptr.hbm [resolvable:$true] %s772_s17 }
 0x238   : > { %s774_s18 = scalar_lea.hbm %s773_s17, 16  ;;  %p779_p0 = scmp.lt.s32.totalorder %s773_s17, %s995_s6 }
 0x239   : > { %p775_p11 = scmp.ne.s32.totalorder %s773_s17, %s774_s18  ;;  %p780_p1 = scmp.lt.s32.totalorder %s778_s26, %s774_s18 }
 0x23b   : > { %p776_p12 = pnand %p775_p11, %p901_p5  ;;  %p781_p2 = por %p780_p1, %p779_p0 }
 0x23d   : > { %p777_p13 = pneg %p776_p12 }
 0x23f   : > { %p782_p3 = pnand %p781_p2, %p777_p13 }
 0x286   : > { %v511_v47 = vpop.permute.xlu2 %510 }
 0x287   : > { %517 = vst.msk [vmem:[#allocation2] sm:$0xff] %vm516_vm6, %v511_v47 }
 0x28e   : > { %v379_v48 = vpop.permute.xlu2 %378  ;;  %v519_v49 = vld [vmem:[#allocation2] sm:$0xff] }
 0x28f   : > { %384 = vst.msk [vmem:[#allocation2 + $0x8] sm:$0xff] %vm382_vm4, %v379_v48  ;;  %695 = vmatmul.msk.f32.vlgmr.msrb.gmra.mxu1 %vm529_vm7, %v519_v49 }
 0x290   : > { %451 = vst.msk [vmem:[#allocation2 + $0x8] sm:$0xff] %vm449_vm5, %v446_v50 }
 0x2a6   : > { %v513_v51 = vpop.permute.xlu1 %512 }
 0x2a7   : > { %518 = vst.msk [vmem:[#allocation2 + $0x8] sm:$0xff] %vm516_vm6, %v513_v51 }
 0x2ae   : > { %v520_v52 = vld [vmem:[#allocation2 + $0x8] sm:$0xff] }
 0x2af   : > { %696 = vmatmul.msk.f32.gmra.mxu1 %vm529_vm7, %v520_v52 }
 0x30c   : > { %v553_v54 = vpop.f32.mrf.mxu1 }
 0x30d   : > { %v554_v55 = vadd.f32 %v757_v53, %v553_v54 }
 0x30f   : > { %559 = vst [vmem:[%s285_s9] sm:$0xff] %v554_v55 }
 0x32c   : > { %v556_v56 = vpop.f32.mrf.mxu1 }
 0x32d   : > { %v557_v57 = vadd.f32 %v757_v53, %v556_v56 }
 0x32f   : > { %560 = vst [vmem:[%s285_s9 + $0x8] sm:$0xff] %v557_v57 }
 0x330   : > { %785 = shalt.err (!%p782_p3)
}
 0x331   : > { %s827_s19 = smov 128  }
 0x332   : > { %710 = dma.vmem_to_hbm [thread:$0]  (%p901_p5), %s575_s14, 256, %s577_s15, %s562_s16, %s827_s19, %s827_s19, %s824_s29  }
 0x333 PF: > { %p716_p4 = scmp.ge.s32.totalorder %s820_s24, 2  ;;  %s591_s9 = sand.u32 1, %s808_s21  }
 0x334   : > { %s592_s11 = scalar_lea.sflag [#allocation4], %s591_s9 }
 0x335   : > { %p713_p7 = pnand %p716_p4, %p905_p6 }
 0x337   : > { %p714_p8 = pneg %p713_p7 }
 0x339   : > { %803 = dma.done.wait (%p714_p8), %s592_s11, 256  }
 0x33a   : > { %805 = vsyncadd (%p714_p8), %s592_s11, 4294967040  ;;  %p16_p9 = scmp.ge.s32.totalorder %s888_s27, 4   ;;  %s998_s21 = smov %s812_s22 }
 0x33b   : > { %s999_s22 = smov %s816_s23  ;;  %s1000_s23 = smov %s899_s30 }
 0x33c   : > { %s1001_s24 = smov %s888_s27  ;;  %18 = sbr.rel (!%p16_p9) target bundleno = 3 (0x3), region = 88 }
 0x341   :  { %598 = vsyncpa [#allocation4], 1 }
 0x342   :  { %600 = vsyncpa [#allocation4 + $0x1], 1 }

</bundles_post_ra>
